<compile_context>
chip_gen: v7x
topology: tpu7x:2x2x1
jax: 0.10.0
libtpu: 0.0.40
codegen_flags: <defaults>
</compile_context>

<pallas_src>
import functools

import jax
import jax.numpy as jnp
from jax.experimental import pallas as pl
from jax.experimental.pallas import tpu as pltpu

LANE = 128


def _round_up(n, m):
    return (n + m - 1) // m * m


# ----------------------------------------------------------------------------
# Raw (PyTorch-equivalent) parameter list
# ----------------------------------------------------------------------------
def _raw_param_specs(x_dim, h_dim, z_dim):
    h, z, x = h_dim, z_dim, x_dim
    return [
        ("pxW1", (x, h)), ("pxb1", (1, h)),
        ("pxW2", (h, h)), ("pxb2", (1, h)),
        ("ppW1", (h, h)), ("ppb1", (1, h)),
        ("ppW2", (h, h)), ("ppb2", (1, h)),
        ("pmW", (h, z)), ("pmb", (1, z)),
        ("psW", (h, z)), ("psb", (1, z)),
        ("peW1", (2 * h, h)), ("peb1", (1, h)),
        ("peW2", (h, h)), ("peb2", (1, h)),
        ("emW", (h, z)), ("emb", (1, z)),
        ("esW", (h, z)), ("esb", (1, z)),
        ("pzW1", (z, h)), ("pzb1", (1, h)),
        ("pzW2", (h, z)), ("pzb2", (1, z)),
        ("pdW1", (h + z, h)), ("pdb1", (1, h)),
        ("pdW2", (h, h)), ("pdb2", (1, h)),
        ("dmW", (h, x)), ("dmb", (1, x)),
        ("dsW", (h, x)), ("dsb", (1, x)),
        ("gWih", (h + z, 3 * h)), ("gbih", (1, 3 * h)),
        ("gWhh", (h, 3 * h)), ("gbhh", (1, 3 * h)),
    ]


def init_params(key, x_dim, h_dim, z_dim, stdv=0.1):
    """Synthetic init matching reset_parameters: N(0, stdv)."""
    specs = _raw_param_specs(x_dim, h_dim, z_dim)
    keys = jax.random.split(key, len(specs))
    return [stdv * jax.random.normal(k, shape, dtype=jnp.float32)
            for k, (_, shape) in zip(keys, specs)]


# ----------------------------------------------------------------------------
# Pure-JAX reference (unpacked params) — used only for verification
# ----------------------------------------------------------------------------
def _vrnn_ref(x, h, eps, params, h_dim):
    (pxW1, pxb1, pxW2, pxb2,
     ppW1, ppb1, ppW2, ppb2,
     pmW, pmb, psW, psb,
     peW1, peb1, peW2, peb2,
     emW, emb, esW, esb,
     pzW1, pzb1, pzW2, pzb2,
     pdW1, pdb1, pdW2, pdb2,
     dmW, dmb, dsW, dsb,
     gWih, gbih, gWhh, gbhh) = params

    lin = lambda a, W, b: jnp.dot(a, W, preferred_element_type=jnp.float32) + b
    relu = lambda a: jnp.maximum(a, 0.0)
    sigmoid = lambda a: 1.0 / (1.0 + jnp.exp(-a))
    softplus = lambda a: jnp.maximum(a, 0.0) + jnp.log1p(jnp.exp(-jnp.abs(a)))

    phi_x = relu(lin(relu(lin(x, pxW1, pxb1)), pxW2, pxb2))

    phi_z_prior = relu(lin(relu(lin(h, ppW1, ppb1)), ppW2, ppb2))
    z_prior_mean = sigmoid(lin(phi_z_prior, pmW, pmb))
    z_prior_std = softplus(lin(phi_z_prior, psW, psb))

    enc_in = jnp.concatenate([phi_x, h], axis=1)
    phi_z_infer = relu(lin(relu(lin(enc_in, peW1, peb1)), peW2, peb2))
    z_infer_mean = sigmoid(lin(phi_z_infer, emW, emb))
    z_infer_std = softplus(lin(phi_z_infer, esW, esb))

    z = eps * z_infer_std + z_infer_mean
    z = relu(lin(relu(lin(z, pzW1, pzb1)), pzW2, pzb2))

    dec_in = jnp.concatenate([z, h], axis=1)
    phi_dec = relu(lin(relu(lin(dec_in, pdW1, pdb1)), pdW2, pdb2))
    dec_mean = sigmoid(lin(phi_dec, dmW, dmb))
    dec_std = softplus(lin(phi_dec, dsW, dsb))

    gru_in = jnp.concatenate([phi_x, z], axis=1)
    gi = jnp.dot(gru_in, gWih, preferred_element_type=jnp.float32) + gbih
    gh = jnp.dot(h, gWhh, preferred_element_type=jnp.float32) + gbhh
    i_r, i_z, i_n = gi[:, :h_dim], gi[:, h_dim:2 * h_dim], gi[:, 2 * h_dim:]
    h_r, h_z, h_n = gh[:, :h_dim], gh[:, h_dim:2 * h_dim], gh[:, 2 * h_dim:]
    r_gate = sigmoid(i_r + h_r)
    z_gate = sigmoid(i_z + h_z)
    n_gate = jnp.tanh(i_n + r_gate * h_n)
    h_new = (1.0 - z_gate) * n_gate + z_gate * h

    return (h_new, phi_x, phi_z_prior, z_prior_mean, z_prior_std,
            phi_z_infer, z_infer_mean, z_infer_std, phi_dec, dec_mean, dec_std)


# ----------------------------------------------------------------------------
# Packed layout (all offsets / widths are static Python ints)
# ----------------------------------------------------------------------------
def _packed_layout(x_dim, h_dim, z_dim):
    h, z, x = h_dim, z_dim, x_dim

    # Weight blocks: (name, kin, kout_used).  kout is zero-padded to a 128-lane
    # multiple inside the slab so every weight load is an unmasked [kin, 128k]
    # lane-dense tile.  kin stays natural (multiple of 8 -> sublane aligned).
    w_blocks = [
        ("W_h",  h, 6 * h),   # fused raw-h consumers: ppW1 | peW1h | pdW1h | gWhh(3h)
        ("pxW1", x, h),
        ("pxW2", h, h),
        ("W_px", h, 4 * h),   # fused phi_x consumers: peW1x | gWih_x(3h)
        ("ppW2", h, h),
        ("prW",  h, 2 * z),   # prior_mean | prior_std (fused head)
        ("peW2", h, h),
        ("enW",  h, 2 * z),   # enc_mean | enc_std (fused head)
        ("pzW1", z, h),
        ("pzW2", h, z),
        ("W_z",  z, 4 * h),   # fused z_feat consumers: pdW1z | gWih_z(3h)
        ("pdW2", h, h),
        ("deW",  h, 2 * x),   # dec_mean | dec_std (fused head)
    ]
    w_width = max(_round_up(ko, LANE) for _, _, ko in w_blocks)
    w_off, row = {}, 0
    for name, kin, kout in w_blocks:
        w_off[name] = (row, kin, kout, _round_up(kout, LANE))
        row += _round_up(kin, 8)
    w_rows = _round_up(row, 8)

    # One bias per row, lane-dense padded width matching the weight's kout pad.
    b_blocks = [
        ("b_h",  6 * h),      # ppb1 | peb1 | pdb1 | gbhh
        ("pxb1", h), ("pxb2", h),
        ("b_px", 4 * h),      # zeros(h) | gbih   (peb1 already added via b_h)
        ("ppb2", h),
        ("prb",  2 * z),
        ("peb2", h),
        ("enb",  2 * z),
        ("pzb1", h), ("pzb2", z),
        ("pdb2", h),
        ("deb",  2 * x),
    ]
    b_off = {name: (i, n, _round_up(n, LANE)) for i, (name, n) in enumerate(b_blocks)}
    b_rows = _round_up(len(b_blocks), 8)
    b_width = max(_round_up(n, LANE) for _, n in b_blocks)

    # Output: one [B, 11*128] slab; output i lives in lanes [i*128, i*128+n).
    out_segs = [
        ("h_new", h), ("phi_x", h), ("phi_z_prior", h),
        ("z_prior_mean", z), ("z_prior_std", z),
        ("phi_z_infer", h), ("z_infer_mean", z), ("z_infer_std", z),
        ("phi_dec", h), ("dec_mean", x), ("dec_std", x),
    ]
    out_width = len(out_segs) * LANE

    return dict(w_off=w_off, w_rows=w_rows, w_width=w_width,
                b_off=b_off, b_rows=b_rows, b_width=b_width,
                out_segs=out_segs, out_width=out_width)


def pack_params(params, x_dim, h_dim, z_dim):
    """Pack the 36 raw params into (weight_slab, bias_slab). Run once at setup.

    On v6e/v7x, cast the returned slabs to bfloat16 for the MXU-native path
    (keep activations/elementwise in f32; this script keeps f32 to match the
    f32 reference exactly).
    """
    h, z, x = h_dim, z_dim, x_dim
    names = [n for n, _ in _raw_param_specs(x_dim, h_dim, z_dim)]
    p = dict(zip(names, params))
    L = _packed_layout(x_dim, h_dim, z_dim)
    cat = lambda *a: jnp.concatenate(a, axis=1)

    peW1, pdW1, gWih, gWhh = p["peW1"], p["pdW1"], p["gWih"], p["gWhh"]
    w_vals = {
        # raw-h consumers fused along kout:  [h, 6h]
        "W_h":  cat(p["ppW1"], peW1[h:], pdW1[z:], gWhh),
        "pxW1": p["pxW1"],
        "pxW2": p["pxW2"],
        # phi_x consumers fused:             [h, 4h]
        "W_px": cat(peW1[:h], gWih[:h]),
        "ppW2": p["ppW2"],
        "prW":  cat(p["pmW"], p["psW"]),
        "peW2": p["peW2"],
        "enW":  cat(p["emW"], p["esW"]),
        "pzW1": p["pzW1"],
        "pzW2": p["pzW2"],
        # z_feat consumers fused:            [z, 4h]
        "W_z":  cat(pdW1[:z], gWih[h:]),
        "pdW2": p["pdW2"],
        "deW":  cat(p["dmW"], p["dsW"]),
    }
    w_slab = jnp.zeros((L["w_rows"], L["w_width"]), jnp.float32)
    for name, (r0, kin, kout, _) in L["w_off"].items():
        w_slab = w_slab.at[r0:r0 + kin, 0:kout].set(w_vals[name])

    zeros_h = jnp.zeros((1, h), jnp.float32)
    b_vals = {
        "b_h":  cat(p["ppb1"], p["peb1"], p["pdb1"], p["gbhh"]),
        "pxb1": p["pxb1"], "pxb2": p["pxb2"],
        "b_px": cat(zeros_h, p["gbih"]),
        "ppb2": p["ppb2"],
        "prb":  cat(p["pmb"], p["psb"]),
        "peb2": p["peb2"],
        "enb":  cat(p["emb"], p["esb"]),
        "pzb1": p["pzb1"], "pzb2": p["pzb2"],
        "pdb2": p["pdb2"],
        "deb":  cat(p["dmb"], p["dsb"]),
    }
    b_slab = jnp.zeros((L["b_rows"], L["b_width"]), jnp.float32)
    for name, (i, n, _) in L["b_off"].items():
        b_slab = b_slab.at[i:i + 1, 0:n].set(b_vals[name])

    return w_slab, b_slab


# ----------------------------------------------------------------------------
# Pallas kernel
# ----------------------------------------------------------------------------
def _vrnn_kernel(layout, x_dim, h_dim, z_dim,
                 x_ref, h_ref, eps_ref, w_ref, b_ref, out_ref):
    h_d, z_d, x_d = h_dim, z_dim, x_dim
    w_off, b_off = layout["w_off"], layout["b_off"]

    def W(name):                                   # lane-dense [kin, 128k] view
        r0, kin, _, kpad = w_off[name]
        return w_ref[r0:r0 + kin, 0:kpad]

    def Bv(name):                                  # lane-dense [1, 128k] view
        i, _, npad = b_off[name]
        return b_ref[i:i + 1, 0:npad]

    relu = lambda a: jnp.maximum(a, 0.0)
    sigmoid = lambda a: 1.0 / (1.0 + jnp.exp(-a))
    softplus = lambda a: jnp.maximum(a, 0.0) + jnp.log1p(jnp.exp(-jnp.abs(a)))
    dot = lambda a, w: jnp.dot(a, w, preferred_element_type=jnp.float32)

    x = x_ref[...]                                 # [B, x]
    h = h_ref[...]                                 # [B, h]
    eps = eps_ref[...]                             # [B, z]

    # ---- fused raw-h matmul (issued first; everything h-side hangs off it)
    # cols: [0:h) prior L1 | [h:2h) enc L1 h-part | [2h:3h) dec L1 h-part |
    #       [3h:6h) GRU hh (r|z|n, gbhh included)
    h_fused = dot(h, W("W_h")) + Bv("b_h")         # [B, 256]
    prior1 = h_fused[:, 0:h_d]
    enc1_h = h_fused[:, h_d:2 * h_d]
    dec1_h = h_fused[:, 2 * h_d:3 * h_d]
    gh = h_fused[:, 3 * h_d:6 * h_d]               # [B, 3h]

    # ---- phi_x branch
    a1 = relu(dot(x, W("pxW1")) + Bv("pxb1"))                      # [B, 128]
    phi_x_full = relu(dot(a1[:, 0:h_d], W("pxW2")) + Bv("pxb2"))   # [B, 128]
    phi_x = phi_x_full[:, 0:h_d]

    # fused phi_x consumers: cols [0:h) enc L1 x-part | [h:4h) GRU ih x-side (+gbih)
    px_fused = dot(phi_x, W("W_px")) + Bv("b_px")  # [B, 128]
    enc1_x = px_fused[:, 0:h_d]
    gi_x = px_fused[:, h_d:4 * h_d]                # [B, 3h]

    # ---- prior branch (fused mean|std head)
    phi_z_prior_full = relu(dot(relu(prior1), W("ppW2")) + Bv("ppb2"))        # [B,128]
    prior_pre = dot(phi_z_prior_full[:, 0:h_d], W("prW")) + Bv("prb")         # [B,128]
    z_prior_mean = sigmoid(prior_pre[:, 0:z_d])
    z_prior_std = softplus(prior_pre[:, z_d:2 * z_d])

    # ---- encoder branch: cat([phi_x, h]) handled by the two fused matmuls
    enc1 = relu(enc1_x + enc1_h)                   # peb1 already added via b_h
    phi_z_infer_full = relu(dot(enc1, W("peW2")) + Bv("peb2"))                # [B,128]
    enc_pre = dot(phi_z_infer_full[:, 0:h_d], W("enW")) + Bv("enb")           # [B,128]
    z_infer_mean = sigmoid(enc_pre[:, 0:z_d])
    z_infer_std = softplus(enc_pre[:, z_d:2 * z_d])

    # ---- reparameterized sample + phi_z
    zs = eps * z_infer_std + z_infer_mean          # [B, z]
    pz1 = relu(dot(zs, W("pzW1")) + Bv("pzb1"))                               # [B,128]
    z_feat_full = relu(dot(pz1[:, 0:h_d], W("pzW2")) + Bv("pzb2"))            # [B,128]
    z_feat = z_feat_full[:, 0:z_d]
    # TODO(synk): use_PNF=True planar-normalizing-flow branch not implemented
    # (module default is use_PNF=False).

    # fused z_feat consumers: cols [0:h) dec L1 z-part | [h:4h) GRU ih z-side
    z_fused = dot(z_feat, W("W_z"))                # [B, 128]  (biases added elsewhere)
    dec1_z = z_fused[:, 0:h_d]
    gi_z = z_fused[:, h_d:4 * h_d]                 # [B, 3h]

    # ---- decoder branch (fused mean|std head)
    dec1 = relu(dec1_z + dec1_h)                   # pdb1 already added via b_h
    phi_dec_full = relu(dot(dec1, W("pdW2")) + Bv("pdb2"))                    # [B,128]
    dec_pre = dot(phi_dec_full[:, 0:h_d], W("deW")) + Bv("deb")               # [B,128]
    dec_mean = sigmoid(dec_pre[:, 0:x_d])
    dec_std = softplus(dec_pre[:, x_d:2 * x_d])

    # ---- GRUCell(cat([phi_x, z_feat]), h) — gates already live in the fused
    #      matmul results; zero extra MXU work, only lane slices + VPU math.
    gi = gi_x + gi_z                               # gbih included via b_px
    r_gate = sigmoid(gi[:, 0:h_d] + gh[:, 0:h_d])
    z_gate = sigmoid(gi[:, h_d:2 * h_d] + gh[:, h_d:2 * h_d])
    n_gate = jnp.tanh(gi[:, 2 * h_d:3 * h_d] + r_gate * gh[:, 2 * h_d:3 * h_d])
    h_new = (1.0 - z_gate) * n_gate + z_gate * h

    # ---- direct stores into 128-lane-aligned output blocks (no concat chain)
    store_vals = {
        "h_new": h_new,
        "phi_x": phi_x_full,                 # full 128-wide unmasked store
        "phi_z_prior": phi_z_prior_full,     # (padding lanes are zero / unread)
        "z_prior_mean": z_prior_mean,
        "z_prior_std": z_prior_std,
        "phi_z_infer": phi_z_infer_full,
        "z_infer_mean": z_infer_mean,
        "z_infer_std": z_infer_std,
        "phi_dec": phi_dec_full,
        "dec_mean": dec_mean,
        "dec_std": dec_std,
    }
    for i, (name, _) in enumerate(layout["out_segs"]):
        v = store_vals[name]
        out_ref[:, i * LANE:i * LANE + v.shape[1]] = v


# ----------------------------------------------------------------------------
# Wrapper
# ----------------------------------------------------------------------------
@functools.partial(jax.jit, static_argnames=("x_dim", "h_dim", "z_dim"))
def vrnn_cell_forward(x, h, eps, w_slab, b_slab, *, x_dim, h_dim, z_dim):
    B = x.shape[0]
    L = _packed_layout(x_dim, h_dim, z_dim)
    kernel = functools.partial(_vrnn_kernel, L, x_dim, h_dim, z_dim)
    vmem = pltpu.MemorySpace.VMEM

    out_slab = pl.pallas_call(
        kernel,
        out_shape=jax.ShapeDtypeStruct((B, L["out_width"]), jnp.float32),
        in_specs=[pl.BlockSpec(memory_space=vmem)] * 5,
        out_specs=pl.BlockSpec(memory_space=vmem),
    )(x.astype(jnp.float32), h.astype(jnp.float32), eps.astype(jnp.float32),
      w_slab, b_slab)

    # Lane-aligned block starts; each output is lanes [i*128, i*128+n).
    return tuple(out_slab[:, i * LANE:i * LANE + n]
                 for i, (_, n) in enumerate(L["out_segs"]))


# ----------------------------------------------------------------------------
if __name__ == "__main__":
    B, X_DIM, H_DIM, Z_DIM = 8, 16, 32, 16

    key = jax.random.PRNGKey(0)
    k_params, k_x, k_h, k_eps = jax.random.split(key, 4)

    params = init_params(k_params, X_DIM, H_DIM, Z_DIM, stdv=0.1)
    x = jax.random.normal(k_x, (B, X_DIM), dtype=jnp.float32)
    h = jax.random.normal(k_h, (B, H_DIM), dtype=jnp.float32)
    eps = jax.random.normal(k_eps, (B, Z_DIM), dtype=jnp.float32)

    # One-time packing of the 36 raw params into two lane-dense slabs.
    w_slab, b_slab = pack_params(params, X_DIM, H_DIM, Z_DIM)
    w_slab, b_slab = jax.block_until_ready((w_slab, b_slab))

    outs = vrnn_cell_forward(x, h, eps, w_slab, b_slab,
                             x_dim=X_DIM, h_dim=H_DIM, z_dim=Z_DIM)
    outs = jax.block_until_ready(outs)

    # Verify against the pure-JAX reference of the original (unpacked) math.
    ref = _vrnn_ref(x, h, eps, params, H_DIM)
    for o, r in zip(outs, ref):
        assert o.shape == r.shape and o.dtype == r.dtype
        assert float(jnp.max(jnp.abs(o - r))) < 1e-4

    print("KERNEL_OK")
</pallas_src>

<mosaic_0001>
module attributes {stable_mosaic.version = 11 : i64} {
  func.func @_vrnn_kernel(%arg0: memref<8x16xf32, #tpu.memory_space<vmem>>, %arg1: memref<8x32xf32, #tpu.memory_space<vmem>>, %arg2: memref<8x16xf32, #tpu.memory_space<vmem>>, %arg3: memref<368x256xf32, #tpu.memory_space<vmem>>, %arg4: memref<16x256xf32, #tpu.memory_space<vmem>>, %arg5: memref<8x1408xf32, #tpu.memory_space<vmem>>) attributes {dimension_semantics = [], scalar_prefetch = 0 : i64, scratch_operands = 0 : i64, tpu.core_type = #tpu.core_type<tc>} {
    %c0 = arith.constant 0 : index
    %c0_0 = arith.constant 0 : index
    %0 = vector.load %arg0[%c0, %c0_0] : memref<8x16xf32, #tpu.memory_space<vmem>>, vector<8x16xf32>
    %c0_1 = arith.constant 0 : index
    %c0_2 = arith.constant 0 : index
    %1 = vector.load %arg1[%c0_1, %c0_2] : memref<8x32xf32, #tpu.memory_space<vmem>>, vector<8x32xf32>
    %c0_3 = arith.constant 0 : index
    %c0_4 = arith.constant 0 : index
    %2 = vector.load %arg2[%c0_3, %c0_4] : memref<8x16xf32, #tpu.memory_space<vmem>>, vector<8x16xf32>
    %c0_5 = arith.constant 0 : index
    %c0_6 = arith.constant 0 : index
    %3 = vector.load %arg3[%c0_5, %c0_6] : memref<368x256xf32, #tpu.memory_space<vmem>>, vector<32x256xf32>
    %cst = arith.constant dense<0.000000e+00> : vector<8x256xf32>
    %4 = tpu.matmul %1, %3, %cst {dimension_numbers = #tpu.dot_dimension_numbers<[1], [0], [0], [1], [0, 0, 1, 1], [], []>} : vector<8x32xf32>, vector<32x256xf32>, vector<8x256xf32> -> vector<8x256xf32>
    %c0_7 = arith.constant 0 : index
    %c0_8 = arith.constant 0 : index
    %5 = vector.load %arg4[%c0_7, %c0_8] : memref<16x256xf32, #tpu.memory_space<vmem>>, vector<1x256xf32>
    %6 = vector.broadcast %5 : vector<1x256xf32> to vector<8x256xf32>
    %7 = arith.addf %4, %6 : vector<8x256xf32>
    %8 = vector.extract_strided_slice %7 {offsets = [0, 0], sizes = [8, 32], strides = [1, 1]} : vector<8x256xf32> to vector<8x32xf32>
    %9 = vector.extract_strided_slice %7 {offsets = [0, 32], sizes = [8, 32], strides = [1, 1]} : vector<8x256xf32> to vector<8x32xf32>
    %10 = vector.extract_strided_slice %7 {offsets = [0, 64], sizes = [8, 32], strides = [1, 1]} : vector<8x256xf32> to vector<8x32xf32>
    %11 = vector.extract_strided_slice %7 {offsets = [0, 96], sizes = [8, 96], strides = [1, 1]} : vector<8x256xf32> to vector<8x96xf32>
    %c32 = arith.constant 32 : index
    %c0_9 = arith.constant 0 : index
    %12 = vector.load %arg3[%c32, %c0_9] : memref<368x256xf32, #tpu.memory_space<vmem>>, vector<16x128xf32>
    %cst_10 = arith.constant dense<0.000000e+00> : vector<8x128xf32>
    %13 = tpu.matmul %0, %12, %cst_10 {dimension_numbers = #tpu.dot_dimension_numbers<[1], [0], [0], [1], [0, 0, 1, 1], [], []>} : vector<8x16xf32>, vector<16x128xf32>, vector<8x128xf32> -> vector<8x128xf32>
    %c1 = arith.constant 1 : index
    %c0_11 = arith.constant 0 : index
    %14 = vector.load %arg4[%c1, %c0_11] : memref<16x256xf32, #tpu.memory_space<vmem>>, vector<1x128xf32>
    %15 = vector.broadcast %14 : vector<1x128xf32> to vector<8x128xf32>
    %16 = arith.addf %13, %15 : vector<8x128xf32>
    %cst_12 = arith.constant 0.000000e+00 : f32
    %17 = vector.broadcast %cst_12 : f32 to vector<8x128xf32>
    %18 = arith.maximumf %16, %17 : vector<8x128xf32>
    %19 = vector.extract_strided_slice %18 {offsets = [0, 0], sizes = [8, 32], strides = [1, 1]} : vector<8x128xf32> to vector<8x32xf32>
    %c48 = arith.constant 48 : index
    %c0_13 = arith.constant 0 : index
    %20 = vector.load %arg3[%c48, %c0_13] : memref<368x256xf32, #tpu.memory_space<vmem>>, vector<32x128xf32>
    %cst_14 = arith.constant dense<0.000000e+00> : vector<8x128xf32>
    %21 = tpu.matmul %19, %20, %cst_14 {dimension_numbers = #tpu.dot_dimension_numbers<[1], [0], [0], [1], [0, 0, 1, 1], [], []>} : vector<8x32xf32>, vector<32x128xf32>, vector<8x128xf32> -> vector<8x128xf32>
    %c2 = arith.constant 2 : index
    %c0_15 = arith.constant 0 : index
    %22 = vector.load %arg4[%c2, %c0_15] : memref<16x256xf32, #tpu.memory_space<vmem>>, vector<1x128xf32>
    %23 = vector.broadcast %22 : vector<1x128xf32> to vector<8x128xf32>
    %24 = arith.addf %21, %23 : vector<8x128xf32>
    %cst_16 = arith.constant 0.000000e+00 : f32
    %25 = vector.broadcast %cst_16 : f32 to vector<8x128xf32>
    %26 = arith.maximumf %24, %25 : vector<8x128xf32>
    %27 = vector.extract_strided_slice %26 {offsets = [0, 0], sizes = [8, 32], strides = [1, 1]} : vector<8x128xf32> to vector<8x32xf32>
    %c80 = arith.constant 80 : index
    %c0_17 = arith.constant 0 : index
    %28 = vector.load %arg3[%c80, %c0_17] : memref<368x256xf32, #tpu.memory_space<vmem>>, vector<32x128xf32>
    %cst_18 = arith.constant dense<0.000000e+00> : vector<8x128xf32>
    %29 = tpu.matmul %27, %28, %cst_18 {dimension_numbers = #tpu.dot_dimension_numbers<[1], [0], [0], [1], [0, 0, 1, 1], [], []>} : vector<8x32xf32>, vector<32x128xf32>, vector<8x128xf32> -> vector<8x128xf32>
    %c3 = arith.constant 3 : index
    %c0_19 = arith.constant 0 : index
    %30 = vector.load %arg4[%c3, %c0_19] : memref<16x256xf32, #tpu.memory_space<vmem>>, vector<1x128xf32>
    %31 = vector.broadcast %30 : vector<1x128xf32> to vector<8x128xf32>
    %32 = arith.addf %29, %31 : vector<8x128xf32>
    %33 = vector.extract_strided_slice %32 {offsets = [0, 0], sizes = [8, 32], strides = [1, 1]} : vector<8x128xf32> to vector<8x32xf32>
    %34 = vector.extract_strided_slice %32 {offsets = [0, 32], sizes = [8, 96], strides = [1, 1]} : vector<8x128xf32> to vector<8x96xf32>
    %cst_20 = arith.constant 0.000000e+00 : f32
    %35 = vector.broadcast %cst_20 : f32 to vector<8x32xf32>
    %36 = arith.maximumf %8, %35 : vector<8x32xf32>
    %c112 = arith.constant 112 : index
    %c0_21 = arith.constant 0 : index
    %37 = vector.load %arg3[%c112, %c0_21] : memref<368x256xf32, #tpu.memory_space<vmem>>, vector<32x128xf32>
    %cst_22 = arith.constant dense<0.000000e+00> : vector<8x128xf32>
    %38 = tpu.matmul %36, %37, %cst_22 {dimension_numbers = #tpu.dot_dimension_numbers<[1], [0], [0], [1], [0, 0, 1, 1], [], []>} : vector<8x32xf32>, vector<32x128xf32>, vector<8x128xf32> -> vector<8x128xf32>
    %c4 = arith.constant 4 : index
    %c0_23 = arith.constant 0 : index
    %39 = vector.load %arg4[%c4, %c0_23] : memref<16x256xf32, #tpu.memory_space<vmem>>, vector<1x128xf32>
    %40 = vector.broadcast %39 : vector<1x128xf32> to vector<8x128xf32>
    %41 = arith.addf %38, %40 : vector<8x128xf32>
    %cst_24 = arith.constant 0.000000e+00 : f32
    %42 = vector.broadcast %cst_24 : f32 to vector<8x128xf32>
    %43 = arith.maximumf %41, %42 : vector<8x128xf32>
    %44 = vector.extract_strided_slice %43 {offsets = [0, 0], sizes = [8, 32], strides = [1, 1]} : vector<8x128xf32> to vector<8x32xf32>
    %c144 = arith.constant 144 : index
    %c0_25 = arith.constant 0 : index
    %45 = vector.load %arg3[%c144, %c0_25] : memref<368x256xf32, #tpu.memory_space<vmem>>, vector<32x128xf32>
    %cst_26 = arith.constant dense<0.000000e+00> : vector<8x128xf32>
    %46 = tpu.matmul %44, %45, %cst_26 {dimension_numbers = #tpu.dot_dimension_numbers<[1], [0], [0], [1], [0, 0, 1, 1], [], []>} : vector<8x32xf32>, vector<32x128xf32>, vector<8x128xf32> -> vector<8x128xf32>
    %c5 = arith.constant 5 : index
    %c0_27 = arith.constant 0 : index
    %47 = vector.load %arg4[%c5, %c0_27] : memref<16x256xf32, #tpu.memory_space<vmem>>, vector<1x128xf32>
    %48 = vector.broadcast %47 : vector<1x128xf32> to vector<8x128xf32>
    %49 = arith.addf %46, %48 : vector<8x128xf32>
    %50 = vector.extract_strided_slice %49 {offsets = [0, 0], sizes = [8, 16], strides = [1, 1]} : vector<8x128xf32> to vector<8x16xf32>
    %cst_28 = arith.constant 0.000000e+00 : f32
    %51 = vector.broadcast %cst_28 : f32 to vector<8x16xf32>
    %52 = arith.subf %51, %50 : vector<8x16xf32>
    %53 = math.exp %52 : vector<8x16xf32>
    %cst_29 = arith.constant 1.000000e+00 : f32
    %54 = vector.broadcast %cst_29 : f32 to vector<8x16xf32>
    %55 = arith.addf %54, %53 : vector<8x16xf32>
    %cst_30 = arith.constant 1.000000e+00 : f32
    %56 = vector.broadcast %cst_30 : f32 to vector<8x16xf32>
    %57 = arith.divf %56, %55 : vector<8x16xf32>
    %58 = vector.extract_strided_slice %49 {offsets = [0, 16], sizes = [8, 16], strides = [1, 1]} : vector<8x128xf32> to vector<8x16xf32>
    %cst_31 = arith.constant 0.000000e+00 : f32
    %59 = vector.broadcast %cst_31 : f32 to vector<8x16xf32>
    %60 = arith.maximumf %58, %59 : vector<8x16xf32>
    %61 = math.absf %58 : vector<8x16xf32>
    %cst_32 = arith.constant 0.000000e+00 : f32
    %62 = vector.broadcast %cst_32 : f32 to vector<8x16xf32>
    %63 = arith.subf %62, %61 : vector<8x16xf32>
    %64 = math.exp %63 : vector<8x16xf32>
    %65 = math.log1p %64 : vector<8x16xf32>
    %66 = arith.addf %60, %65 : vector<8x16xf32>
    %67 = arith.addf %33, %9 : vector<8x32xf32>
    %cst_33 = arith.constant 0.000000e+00 : f32
    %68 = vector.broadcast %cst_33 : f32 to vector<8x32xf32>
    %69 = arith.maximumf %67, %68 : vector<8x32xf32>
    %c176 = arith.constant 176 : index
    %c0_34 = arith.constant 0 : index
    %70 = vector.load %arg3[%c176, %c0_34] : memref<368x256xf32, #tpu.memory_space<vmem>>, vector<32x128xf32>
    %cst_35 = arith.constant dense<0.000000e+00> : vector<8x128xf32>
    %71 = tpu.matmul %69, %70, %cst_35 {dimension_numbers = #tpu.dot_dimension_numbers<[1], [0], [0], [1], [0, 0, 1, 1], [], []>} : vector<8x32xf32>, vector<32x128xf32>, vector<8x128xf32> -> vector<8x128xf32>
    %c6 = arith.constant 6 : index
    %c0_36 = arith.constant 0 : index
    %72 = vector.load %arg4[%c6, %c0_36] : memref<16x256xf32, #tpu.memory_space<vmem>>, vector<1x128xf32>
    %73 = vector.broadcast %72 : vector<1x128xf32> to vector<8x128xf32>
    %74 = arith.addf %71, %73 : vector<8x128xf32>
    %cst_37 = arith.constant 0.000000e+00 : f32
    %75 = vector.broadcast %cst_37 : f32 to vector<8x128xf32>
    %76 = arith.maximumf %74, %75 : vector<8x128xf32>
    %77 = vector.extract_strided_slice %76 {offsets = [0, 0], sizes = [8, 32], strides = [1, 1]} : vector<8x128xf32> to vector<8x32xf32>
    %c208 = arith.constant 208 : index
    %c0_38 = arith.constant 0 : index
    %78 = vector.load %arg3[%c208, %c0_38] : memref<368x256xf32, #tpu.memory_space<vmem>>, vector<32x128xf32>
    %cst_39 = arith.constant dense<0.000000e+00> : vector<8x128xf32>
    %79 = tpu.matmul %77, %78, %cst_39 {dimension_numbers = #tpu.dot_dimension_numbers<[1], [0], [0], [1], [0, 0, 1, 1], [], []>} : vector<8x32xf32>, vector<32x128xf32>, vector<8x128xf32> -> vector<8x128xf32>
    %c7 = arith.constant 7 : index
    %c0_40 = arith.constant 0 : index
    %80 = vector.load %arg4[%c7, %c0_40] : memref<16x256xf32, #tpu.memory_space<vmem>>, vector<1x128xf32>
    %81 = vector.broadcast %80 : vector<1x128xf32> to vector<8x128xf32>
    %82 = arith.addf %79, %81 : vector<8x128xf32>
    %83 = vector.extract_strided_slice %82 {offsets = [0, 0], sizes = [8, 16], strides = [1, 1]} : vector<8x128xf32> to vector<8x16xf32>
    %cst_41 = arith.constant 0.000000e+00 : f32
    %84 = vector.broadcast %cst_41 : f32 to vector<8x16xf32>
    %85 = arith.subf %84, %83 : vector<8x16xf32>
    %86 = math.exp %85 : vector<8x16xf32>
    %cst_42 = arith.constant 1.000000e+00 : f32
    %87 = vector.broadcast %cst_42 : f32 to vector<8x16xf32>
    %88 = arith.addf %87, %86 : vector<8x16xf32>
    %cst_43 = arith.constant 1.000000e+00 : f32
    %89 = vector.broadcast %cst_43 : f32 to vector<8x16xf32>
    %90 = arith.divf %89, %88 : vector<8x16xf32>
    %91 = vector.extract_strided_slice %82 {offsets = [0, 16], sizes = [8, 16], strides = [1, 1]} : vector<8x128xf32> to vector<8x16xf32>
    %cst_44 = arith.constant 0.000000e+00 : f32
    %92 = vector.broadcast %cst_44 : f32 to vector<8x16xf32>
    %93 = arith.maximumf %91, %92 : vector<8x16xf32>
    %94 = math.absf %91 : vector<8x16xf32>
    %cst_45 = arith.constant 0.000000e+00 : f32
    %95 = vector.broadcast %cst_45 : f32 to vector<8x16xf32>
    %96 = arith.subf %95, %94 : vector<8x16xf32>
    %97 = math.exp %96 : vector<8x16xf32>
    %98 = math.log1p %97 : vector<8x16xf32>
    %99 = arith.addf %93, %98 : vector<8x16xf32>
    %100 = arith.mulf %2, %99 : vector<8x16xf32>
    %101 = arith.addf %100, %90 : vector<8x16xf32>
    %c240 = arith.constant 240 : index
    %c0_46 = arith.constant 0 : index
    %102 = vector.load %arg3[%c240, %c0_46] : memref<368x256xf32, #tpu.memory_space<vmem>>, vector<16x128xf32>
    %cst_47 = arith.constant dense<0.000000e+00> : vector<8x128xf32>
    %103 = tpu.matmul %101, %102, %cst_47 {dimension_numbers = #tpu.dot_dimension_numbers<[1], [0], [0], [1], [0, 0, 1, 1], [], []>} : vector<8x16xf32>, vector<16x128xf32>, vector<8x128xf32> -> vector<8x128xf32>
    %c8 = arith.constant 8 : index
    %c0_48 = arith.constant 0 : index
    %104 = vector.load %arg4[%c8, %c0_48] : memref<16x256xf32, #tpu.memory_space<vmem>>, vector<1x128xf32>
    %105 = vector.broadcast %104 : vector<1x128xf32> to vector<8x128xf32>
    %106 = arith.addf %103, %105 : vector<8x128xf32>
    %cst_49 = arith.constant 0.000000e+00 : f32
    %107 = vector.broadcast %cst_49 : f32 to vector<8x128xf32>
    %108 = arith.maximumf %106, %107 : vector<8x128xf32>
    %109 = vector.extract_strided_slice %108 {offsets = [0, 0], sizes = [8, 32], strides = [1, 1]} : vector<8x128xf32> to vector<8x32xf32>
    %c256 = arith.constant 256 : index
    %c0_50 = arith.constant 0 : index
    %110 = vector.load %arg3[%c256, %c0_50] : memref<368x256xf32, #tpu.memory_space<vmem>>, vector<32x128xf32>
    %cst_51 = arith.constant dense<0.000000e+00> : vector<8x128xf32>
    %111 = tpu.matmul %109, %110, %cst_51 {dimension_numbers = #tpu.dot_dimension_numbers<[1], [0], [0], [1], [0, 0, 1, 1], [], []>} : vector<8x32xf32>, vector<32x128xf32>, vector<8x128xf32> -> vector<8x128xf32>
    %c9 = arith.constant 9 : index
    %c0_52 = arith.constant 0 : index
    %112 = vector.load %arg4[%c9, %c0_52] : memref<16x256xf32, #tpu.memory_space<vmem>>, vector<1x128xf32>
    %113 = vector.broadcast %112 : vector<1x128xf32> to vector<8x128xf32>
    %114 = arith.addf %111, %113 : vector<8x128xf32>
    %cst_53 = arith.constant 0.000000e+00 : f32
    %115 = vector.broadcast %cst_53 : f32 to vector<8x128xf32>
    %116 = arith.maximumf %114, %115 : vector<8x128xf32>
    %117 = vector.extract_strided_slice %116 {offsets = [0, 0], sizes = [8, 16], strides = [1, 1]} : vector<8x128xf32> to vector<8x16xf32>
    %c288 = arith.constant 288 : index
    %c0_54 = arith.constant 0 : index
    %118 = vector.load %arg3[%c288, %c0_54] : memref<368x256xf32, #tpu.memory_space<vmem>>, vector<16x128xf32>
    %cst_55 = arith.constant dense<0.000000e+00> : vector<8x128xf32>
    %119 = tpu.matmul %117, %118, %cst_55 {dimension_numbers = #tpu.dot_dimension_numbers<[1], [0], [0], [1], [0, 0, 1, 1], [], []>} : vector<8x16xf32>, vector<16x128xf32>, vector<8x128xf32> -> vector<8x128xf32>
    %120 = vector.extract_strided_slice %119 {offsets = [0, 0], sizes = [8, 32], strides = [1, 1]} : vector<8x128xf32> to vector<8x32xf32>
    %121 = vector.extract_strided_slice %119 {offsets = [0, 32], sizes = [8, 96], strides = [1, 1]} : vector<8x128xf32> to vector<8x96xf32>
    %122 = arith.addf %120, %10 : vector<8x32xf32>
    %cst_56 = arith.constant 0.000000e+00 : f32
    %123 = vector.broadcast %cst_56 : f32 to vector<8x32xf32>
    %124 = arith.maximumf %122, %123 : vector<8x32xf32>
    %c304 = arith.constant 304 : index
    %c0_57 = arith.constant 0 : index
    %125 = vector.load %arg3[%c304, %c0_57] : memref<368x256xf32, #tpu.memory_space<vmem>>, vector<32x128xf32>
    %cst_58 = arith.constant dense<0.000000e+00> : vector<8x128xf32>
    %126 = tpu.matmul %124, %125, %cst_58 {dimension_numbers = #tpu.dot_dimension_numbers<[1], [0], [0], [1], [0, 0, 1, 1], [], []>} : vector<8x32xf32>, vector<32x128xf32>, vector<8x128xf32> -> vector<8x128xf32>
    %c10 = arith.constant 10 : index
    %c0_59 = arith.constant 0 : index
    %127 = vector.load %arg4[%c10, %c0_59] : memref<16x256xf32, #tpu.memory_space<vmem>>, vector<1x128xf32>
    %128 = vector.broadcast %127 : vector<1x128xf32> to vector<8x128xf32>
    %129 = arith.addf %126, %128 : vector<8x128xf32>
    %cst_60 = arith.constant 0.000000e+00 : f32
    %130 = vector.broadcast %cst_60 : f32 to vector<8x128xf32>
    %131 = arith.maximumf %129, %130 : vector<8x128xf32>
    %132 = vector.extract_strided_slice %131 {offsets = [0, 0], sizes = [8, 32], strides = [1, 1]} : vector<8x128xf32> to vector<8x32xf32>
    %c336 = arith.constant 336 : index
    %c0_61 = arith.constant 0 : index
    %133 = vector.load %arg3[%c336, %c0_61] : memref<368x256xf32, #tpu.memory_space<vmem>>, vector<32x128xf32>
    %cst_62 = arith.constant dense<0.000000e+00> : vector<8x128xf32>
    %134 = tpu.matmul %132, %133, %cst_62 {dimension_numbers = #tpu.dot_dimension_numbers<[1], [0], [0], [1], [0, 0, 1, 1], [], []>} : vector<8x32xf32>, vector<32x128xf32>, vector<8x128xf32> -> vector<8x128xf32>
    %c11 = arith.constant 11 : index
    %c0_63 = arith.constant 0 : index
    %135 = vector.load %arg4[%c11, %c0_63] : memref<16x256xf32, #tpu.memory_space<vmem>>, vector<1x128xf32>
    %136 = vector.broadcast %135 : vector<1x128xf32> to vector<8x128xf32>
    %137 = arith.addf %134, %136 : vector<8x128xf32>
    %138 = vector.extract_strided_slice %137 {offsets = [0, 0], sizes = [8, 16], strides = [1, 1]} : vector<8x128xf32> to vector<8x16xf32>
    %cst_64 = arith.constant 0.000000e+00 : f32
    %139 = vector.broadcast %cst_64 : f32 to vector<8x16xf32>
    %140 = arith.subf %139, %138 : vector<8x16xf32>
    %141 = math.exp %140 : vector<8x16xf32>
    %cst_65 = arith.constant 1.000000e+00 : f32
    %142 = vector.broadcast %cst_65 : f32 to vector<8x16xf32>
    %143 = arith.addf %142, %141 : vector<8x16xf32>
    %cst_66 = arith.constant 1.000000e+00 : f32
    %144 = vector.broadcast %cst_66 : f32 to vector<8x16xf32>
    %145 = arith.divf %144, %143 : vector<8x16xf32>
    %146 = vector.extract_strided_slice %137 {offsets = [0, 16], sizes = [8, 16], strides = [1, 1]} : vector<8x128xf32> to vector<8x16xf32>
    %cst_67 = arith.constant 0.000000e+00 : f32
    %147 = vector.broadcast %cst_67 : f32 to vector<8x16xf32>
    %148 = arith.maximumf %146, %147 : vector<8x16xf32>
    %149 = math.absf %146 : vector<8x16xf32>
    %cst_68 = arith.constant 0.000000e+00 : f32
    %150 = vector.broadcast %cst_68 : f32 to vector<8x16xf32>
    %151 = arith.subf %150, %149 : vector<8x16xf32>
    %152 = math.exp %151 : vector<8x16xf32>
    %153 = math.log1p %152 : vector<8x16xf32>
    %154 = arith.addf %148, %153 : vector<8x16xf32>
    %155 = arith.addf %34, %121 : vector<8x96xf32>
    %156 = vector.extract_strided_slice %155 {offsets = [0, 0], sizes = [8, 32], strides = [1, 1]} : vector<8x96xf32> to vector<8x32xf32>
    %157 = vector.extract_strided_slice %11 {offsets = [0, 0], sizes = [8, 32], strides = [1, 1]} : vector<8x96xf32> to vector<8x32xf32>
    %158 = arith.addf %156, %157 : vector<8x32xf32>
    %cst_69 = arith.constant 0.000000e+00 : f32
    %159 = vector.broadcast %cst_69 : f32 to vector<8x32xf32>
    %160 = arith.subf %159, %158 : vector<8x32xf32>
    %161 = math.exp %160 : vector<8x32xf32>
    %cst_70 = arith.constant 1.000000e+00 : f32
    %162 = vector.broadcast %cst_70 : f32 to vector<8x32xf32>
    %163 = arith.addf %162, %161 : vector<8x32xf32>
    %cst_71 = arith.constant 1.000000e+00 : f32
    %164 = vector.broadcast %cst_71 : f32 to vector<8x32xf32>
    %165 = arith.divf %164, %163 : vector<8x32xf32>
    %166 = vector.extract_strided_slice %155 {offsets = [0, 32], sizes = [8, 32], strides = [1, 1]} : vector<8x96xf32> to vector<8x32xf32>
    %167 = vector.extract_strided_slice %11 {offsets = [0, 32], sizes = [8, 32], strides = [1, 1]} : vector<8x96xf32> to vector<8x32xf32>
    %168 = arith.addf %166, %167 : vector<8x32xf32>
    %cst_72 = arith.constant 0.000000e+00 : f32
    %169 = vector.broadcast %cst_72 : f32 to vector<8x32xf32>
    %170 = arith.subf %169, %168 : vector<8x32xf32>
    %171 = math.exp %170 : vector<8x32xf32>
    %cst_73 = arith.constant 1.000000e+00 : f32
    %172 = vector.broadcast %cst_73 : f32 to vector<8x32xf32>
    %173 = arith.addf %172, %171 : vector<8x32xf32>
    %cst_74 = arith.constant 1.000000e+00 : f32
    %174 = vector.broadcast %cst_74 : f32 to vector<8x32xf32>
    %175 = arith.divf %174, %173 : vector<8x32xf32>
    %176 = vector.extract_strided_slice %155 {offsets = [0, 64], sizes = [8, 32], strides = [1, 1]} : vector<8x96xf32> to vector<8x32xf32>
    %177 = vector.extract_strided_slice %11 {offsets = [0, 64], sizes = [8, 32], strides = [1, 1]} : vector<8x96xf32> to vector<8x32xf32>
    %178 = arith.mulf %165, %177 : vector<8x32xf32>
    %179 = arith.addf %176, %178 : vector<8x32xf32>
    %180 = math.tanh %179 : vector<8x32xf32>
    %cst_75 = arith.constant 1.000000e+00 : f32
    %181 = vector.broadcast %cst_75 : f32 to vector<8x32xf32>
    %182 = arith.subf %181, %175 : vector<8x32xf32>
    %183 = arith.mulf %182, %180 : vector<8x32xf32>
    %184 = arith.mulf %175, %1 : vector<8x32xf32>
    %185 = arith.addf %183, %184 : vector<8x32xf32>
    %c0_76 = arith.constant 0 : index
    %c0_77 = arith.constant 0 : index
    %186 = vector.load %arg5[%c0_76, %c0_77] : memref<8x1408xf32, #tpu.memory_space<vmem>>, vector<8x32xf32>
    tpu.vector_store %arg5[%c0_76, %c0_77], %185 {strides = array<i32>} : memref<8x1408xf32, #tpu.memory_space<vmem>>, vector<8x32xf32>,
    %c0_78 = arith.constant 0 : index
    %c128 = arith.constant 128 : index
    %187 = vector.load %arg5[%c0_78, %c128] : memref<8x1408xf32, #tpu.memory_space<vmem>>, vector<8x128xf32>
    tpu.vector_store %arg5[%c0_78, %c128], %26 {strides = array<i32>} : memref<8x1408xf32, #tpu.memory_space<vmem>>, vector<8x128xf32>,
    %c0_79 = arith.constant 0 : index
    %c256_80 = arith.constant 256 : index
    %188 = vector.load %arg5[%c0_79, %c256_80] : memref<8x1408xf32, #tpu.memory_space<vmem>>, vector<8x128xf32>
    tpu.vector_store %arg5[%c0_79, %c256_80], %43 {strides = array<i32>} : memref<8x1408xf32, #tpu.memory_space<vmem>>, vector<8x128xf32>,
    %c0_81 = arith.constant 0 : index
    %c384 = arith.constant 384 : index
    %189 = vector.load %arg5[%c0_81, %c384] : memref<8x1408xf32, #tpu.memory_space<vmem>>, vector<8x16xf32>
    tpu.vector_store %arg5[%c0_81, %c384], %57 {strides = array<i32>} : memref<8x1408xf32, #tpu.memory_space<vmem>>, vector<8x16xf32>,
    %c0_82 = arith.constant 0 : index
    %c512 = arith.constant 512 : index
    %190 = vector.load %arg5[%c0_82, %c512] : memref<8x1408xf32, #tpu.memory_space<vmem>>, vector<8x16xf32>
    tpu.vector_store %arg5[%c0_82, %c512], %66 {strides = array<i32>} : memref<8x1408xf32, #tpu.memory_space<vmem>>, vector<8x16xf32>,
    %c0_83 = arith.constant 0 : index
    %c640 = arith.constant 640 : index
    %191 = vector.load %arg5[%c0_83, %c640] : memref<8x1408xf32, #tpu.memory_space<vmem>>, vector<8x128xf32>
    tpu.vector_store %arg5[%c0_83, %c640], %76 {strides = array<i32>} : memref<8x1408xf32, #tpu.memory_space<vmem>>, vector<8x128xf32>,
    %c0_84 = arith.constant 0 : index
    %c768 = arith.constant 768 : index
    %192 = vector.load %arg5[%c0_84, %c768] : memref<8x1408xf32, #tpu.memory_space<vmem>>, vector<8x16xf32>
    tpu.vector_store %arg5[%c0_84, %c768], %90 {strides = array<i32>} : memref<8x1408xf32, #tpu.memory_space<vmem>>, vector<8x16xf32>,
    %c0_85 = arith.constant 0 : index
    %c896 = arith.constant 896 : index
    %193 = vector.load %arg5[%c0_85, %c896] : memref<8x1408xf32, #tpu.memory_space<vmem>>, vector<8x16xf32>
    tpu.vector_store %arg5[%c0_85, %c896], %99 {strides = array<i32>} : memref<8x1408xf32, #tpu.memory_space<vmem>>, vector<8x16xf32>,
    %c0_86 = arith.constant 0 : index
    %c1024 = arith.constant 1024 : index
    %194 = vector.load %arg5[%c0_86, %c1024] : memref<8x1408xf32, #tpu.memory_space<vmem>>, vector<8x128xf32>
    tpu.vector_store %arg5[%c0_86, %c1024], %131 {strides = array<i32>} : memref<8x1408xf32, #tpu.memory_space<vmem>>, vector<8x128xf32>,
    %c0_87 = arith.constant 0 : index
    %c1152 = arith.constant 1152 : index
    %195 = vector.load %arg5[%c0_87, %c1152] : memref<8x1408xf32, #tpu.memory_space<vmem>>, vector<8x16xf32>
    tpu.vector_store %arg5[%c0_87, %c1152], %145 {strides = array<i32>} : memref<8x1408xf32, #tpu.memory_space<vmem>>, vector<8x16xf32>,
    %c0_88 = arith.constant 0 : index
    %c1280 = arith.constant 1280 : index
    %196 = vector.load %arg5[%c0_88, %c1280] : memref<8x1408xf32, #tpu.memory_space<vmem>>, vector<8x16xf32>
    tpu.vector_store %arg5[%c0_88, %c1280], %154 {strides = array<i32>} : memref<8x1408xf32, #tpu.memory_space<vmem>>, vector<8x16xf32>,
    return
  }
}

</mosaic_0001>

<bundles_post_ra>
// kernel: vrnn_cell_forward.1
= control target key start
LH: loop header
LB: loop body
LE: loop exit
PB: predicated region body
PF: predicated region fallthrough
CT: control target
= control target key end

     0   :  { %10 = vsyncpa [#allocation3], 0  ;;  %s1877_s0 = inlined_call_operand.hbm [shape: f32[8,16], index: 0, kind: input, shape index: {}]   ;;  %s1878_s1 = inlined_call_operand.hbm [shape: f32[8,32], index: 1, kind: input, shape index: {}]   ;;  %s1879_s2 = inlined_call_operand.vmem [shape: f32[8,16], index: 2, kind: input, shape index: {}]   ;;  %s1880_s3 = inlined_call_operand.hbm [shape: f32[368,256], index: 3, kind: input, shape index: {}]   ;;  %s1881_s4 = inlined_call_operand.hbm [shape: f32[16,256], index: 4, kind: input, shape index: {}]   ;;  %s1882_s5 = inlined_call_operand.vmem [shape: f32[8,1408], index: 5, kind: output, shape index: {}]  }
   0x1   :  { %11 = vsyncpa [#allocation5], 0 }
   0x2   :  { %12 = vsyncpa [#allocation8], 0  ;;  %s1652_s18 = smov [#allocation4]   ;;  %s1653_s20 = smov [#allocation2]  }
   0x3   :  { %s29_s19 = sshll.u32 %s1652_s18, 4  ;;  %s19_s21 = sshll.u32 %s1653_s20, 4  ;;  %s30_s19 = int_to_ptr.vmem [resolvable:$true] %s29_s19  ;;  %s20_s21 = int_to_ptr.vmem [resolvable:$true] %s19_s21 }
   0x4   :  { %s1558_s24 = scalar_lea.hbm %s1878_s1, 128 }
   0x5   :  { %p1559_p0 = scmp.ne.s32.totalorder %s1878_s1, %s1558_s24  ;;  %p1562_p1 = scmp.lt.u32.totalorder %s1558_s24, %s1878_s1 }
   0x7   :  { %p1564_p2 = pnand %p1562_p1, %p1559_p0 }
   0x9   :  { %1567 = shalt.err (!%p1564_p2)
}
   0xa   :  { %s1568_s29 = scalar_lea.vmem %s30_s19, 128  ;;  %p1573_p4 = scmp.lt.s32.totalorder %s30_s19, %s30_s19 }
   0xb   :  { %p1569_p3 = scmp.ne.s32.totalorder %s30_s19, %s1568_s29  ;;  %p1574_p5 = scmp.lt.s32.totalorder %s1568_s29, %s1568_s29 }
   0xd   :  { %p1575_p6 = por %p1574_p5, %p1573_p4 }
   0xf   :  { %p1576_p7 = pnand %p1575_p6, %p1569_p3 }
  0x11   :  { %1579 = shalt.err (!%p1576_p7)
}
  0x12   :  { %32 = dma.hbm_to_vmem [thread:$0]  %s1878_s1, 128, %s30_s19, [#allocation5]  }
  0x13   :  { %s1580_s9 = scalar_lea.hbm %s1877_s0, 128 }
  0x14   :  { %p1581_p8 = scmp.ne.s32.totalorder %s1877_s0, %s1580_s9  ;;  %p1584_p9 = scmp.lt.u32.totalorder %s1580_s9, %s1877_s0 }
  0x16   :  { %p1586_p10 = pnand %p1584_p9, %p1581_p8 }
  0x18   :  { %1589 = shalt.err (!%p1586_p10)
}
  0x19   :  { %s1590_s14 = scalar_lea.vmem %s20_s21, 128  ;;  %p1595_p12 = scmp.lt.s32.totalorder %s20_s21, %s20_s21 }
  0x1a   :  { %p1591_p11 = scmp.ne.s32.totalorder %s20_s21, %s1590_s14  ;;  %p1596_p13 = scmp.lt.s32.totalorder %s1590_s14, %s1590_s14 }
  0x1c   :  { %p1597_p0 = por %p1596_p13, %p1595_p12 }
  0x1e   :  { %p1598_p1 = pnand %p1597_p0, %p1591_p11 }
  0x20   :  { %1601 = shalt.err (!%p1598_p1)
}
  0x21   :  { %22 = dma.hbm_to_vmem [thread:$0]  %s1877_s0, 128, %s20_s21, [#allocation3]  }
  0x22   :  { %s1654_s16 = smov [#allocation6]   ;;  %s1602_s20 = scalar_lea.hbm %s1880_s3, 11776 }
  0x23   :  { %s40_s17 = sshll.u32 %s1654_s16, 4  ;;  %p1603_p2 = scmp.ne.s32.totalorder %s1880_s3, %s1602_s20  ;;  %s41_s17 = int_to_ptr.vmem [resolvable:$true] %s40_s17 }
  0x24   :  { %p1606_p3 = scmp.lt.u32.totalorder %s1602_s20, %s1880_s3 }
  0x26   :  { %p1608_p4 = pnand %p1606_p3, %p1603_p2 }
  0x28   :  { %1611 = shalt.err (!%p1608_p4)
}
  0x29   :  { %s1612_s26 = scalar_lea.vmem %s41_s17, 11776  ;;  %p1617_p6 = scmp.lt.s32.totalorder %s41_s17, %s41_s17 }
  0x2a   :  { %p1613_p5 = scmp.ne.s32.totalorder %s41_s17, %s1612_s26  ;;  %p1618_p7 = scmp.lt.s32.totalorder %s1612_s26, %s1612_s26 }
  0x2c   :  { %p1619_p8 = por %p1618_p7, %p1617_p6 }
  0x2e   :  { %p1620_p9 = pnand %p1619_p8, %p1613_p5 }
  0x30   :  { %1623 = shalt.err (!%p1620_p9)
}
  0x31   :  { %s1655_s0 = smov 256   ;;  %s1656_s21 = smov 16  }
  0x32   :  { %46 = dma.hbm_to_vmem [thread:$0]  %s1880_s3, 11776, %s41_s17, [#allocation5], %s1655_s0, %s1655_s0, %s1656_s21  }
  0x33   :  { %s1657_s29 = smov [#allocation7]   ;;  %s1624_s8 = scalar_lea.hbm %s1881_s4, 512 }
  0x34   :  { %s52_s30 = sshll.u32 %s1657_s29, 4  ;;  %p1625_p10 = scmp.ne.s32.totalorder %s1881_s4, %s1624_s8  ;;  %s53_s30 = int_to_ptr.vmem [resolvable:$true] %s52_s30 }
  0x35   :  { %p1628_p11 = scmp.lt.u32.totalorder %s1624_s8, %s1881_s4 }
  0x37   :  { %p1630_p12 = pnand %p1628_p11, %p1625_p10 }
  0x39   :  { %1633 = shalt.err (!%p1630_p12)
}
  0x3a   :  { %s1634_s13 = scalar_lea.vmem %s53_s30, 512  ;;  %p1639_p0 = scmp.lt.s32.totalorder %s53_s30, %s53_s30 }
  0x3b   :  { %p1635_p13 = scmp.ne.s32.totalorder %s53_s30, %s1634_s13  ;;  %p1640_p1 = scmp.lt.s32.totalorder %s1634_s13, %s1634_s13 }
  0x3d   :  { %p1641_p2 = por %p1640_p1, %p1639_p0 }
  0x3f   :  { %p1642_p3 = pnand %p1641_p2, %p1635_p13 }
  0x41   :  { %1645 = shalt.err (!%p1642_p3)
}
  0x42   :  { %58 = dma.hbm_to_vmem [thread:$0]  %s1881_s4, 512, %s53_s30, [#allocation8], %s1655_s0, %s1655_s0, %s1656_s21  }
  0x43   :  { %1646 = dma.done.wait [#allocation3], 128  }
  0x44   :  { %1647 = vsyncadd [#allocation3], 4294967168 }
  0x45   :  { %1648 = dma.done.wait [#allocation5], 11904  }
  0x46   :  { %1649 = vsyncadd [#allocation5], 4294955392 }
  0x47   :  { %1650 = dma.done.wait [#allocation8], 512  }
  0x48   :  { %1651 = vsyncadd [#allocation8], 4294966784  ;;  %v1658_v0 = vmov 0.0|0.0   ;;  %vm1659_vm0 = vmmov 0   ;;  %v1660_v1 = vmov 0.0   ;;  %v169_v2 = vld [vmem:[#allocation6 + $0x40] sm:$0xff]  ;;  %v84_v38 = vlaneseq }
  0x49   :  { %1449 = vmatprep.subr.bf16.mxu1 %v1658_v0  ;;  %1325 = vmatprep.mubr.msk.f32.mxu1 %vm1659_vm0, %v1660_v1  ;;  %v170_v3 = vld [vmem:[#allocation6 + $0x50] sm:$0xff]  ;;  %v247_v5 = vld [vmem:[#allocation6 + $0x60] sm:$0xff]  ;;  %vm172_vm1 = vcmask 130048   ;;  %v75_v12 = vld [vmem:[#allocation6 + $0x8] sm:$0xff]  ;;  %vm94_vm2 = vcmask 261120   ;;  %s1661_s4 = smov 64  }
  0x4a   :  { %162 = vmatprep.mubr.f32.mxu0 %v1660_v1  ;;  %v1450_v4 = vpack.c.bf16 %v170_v3, %v169_v2  ;;  %v248_v6 = vld [vmem:[#allocation6 + $0x70] sm:$0xff]  ;;  %v249_v9 = vld [vmem:[#allocation6 + $0x80] sm:$0xff]  ;;  %v77_v13 = vld [vmem:[#allocation6 + $0x18] sm:$0xff]  ;;  %v85_v42 = vshrl.u32 %v84_v38, 7  ;;  %s1662_s1 = smov 96   ;;  %s1663_s26 = smov 112  }
  0x4b   :  { %v71_v7 = vld [vmem:[#allocation2] sm:$0xff]  ;;  %v1453_v8 = vpack.c.bf16 %v248_v6, %v247_v5  ;;  %v74_v14 = vld [vmem:[#allocation6] sm:$0xff]  ;;  %v1441_v15 = vpack.c.bf16 %v77_v13, %v75_v12  ;;  %v79_v17 = vld [vmem:[#allocation6 + $0x28] sm:$0xff] }
  0x4c   :  { %1451 = vmatpush3.bf16.msra.mxu1 %v1450_v4  ;;  %v250_v10 = vld [vmem:[#allocation6 + $0x90] sm:$0xff]  ;;  %v81_v18 = vld [vmem:[#allocation6 + $0x38] sm:$0xff]  ;;  %v78_v21 = vld [vmem:[#allocation6 + $0x20] sm:$0xff]  ;;  %v86_v45 = vsub.s32 0, %v85_v42  ;;  %v90_v46 = vsub.s32 1, %v85_v42 }
  0x4d   :  { %1452 = vmatprep.subr.bf16.mxu1 %v1658_v0  ;;  %v1456_v11 = vpack.c.bf16 %v250_v10, %v249_v9  ;;  %v76_v16 = vld [vmem:[#allocation6 + $0x10] sm:$0xff]  ;;  %v1445_v20 = vpack.c.bf16 %v81_v18, %v79_v17  ;;  %1442 = vmatprep.subr.bf16.mxu0 %v1441_v15  ;;  %v326_v24 = vld [vmem:[#allocation6 + $0xa0] sm:$0xff]  ;;  %v1752_v26 = vld [vmem:[#allocation4] sm:$0xff] }
  0x4e   :  { %v1443_v19 = vpack.c.bf16 %v76_v16, %v74_v14  ;;  %v80_v22 = vld [vmem:[#allocation6 + $0x30] sm:$0xff]  ;;  %v171_v28 = vld [vmem:[#allocation7 + $0x1] ss:$0 sm:$0xff]  ;;  %v82_v43 = vld [vmem:[#allocation7] ss:$8 sm:$0x3] }
  0x4f   :  { %1326 = vmatmul.mubr.msk.f32.vlgmr.msra.gmra.mrb[0].mxu1 %vm172_vm1, %v71_v7  ;;  %v1447_v23 = vpack.c.bf16 %v80_v22, %v78_v21  ;;  %v327_v25 = vld [vmem:[#allocation6 + $0xb0] sm:$0xff]  ;;  %v328_v33 = vld [vmem:[#allocation6 + $0xc0] sm:$0xff]  ;;  %v87_v47 = vrot.slane %v82_v43, %v86_v45  ;;  %v91_v49 = vrot.slane %v82_v43, %v90_v46 }
  0x50   :  { %1454 = vmatpush3.bf16.msra.mxu1 %v1453_v8  ;;  %1336 = vmatprep.mubr.msk.f32.mxu1 %vm1659_vm0, %v1660_v1  ;;  %v1459_v27 = vpack.c.bf16 %v327_v25, %v326_v24  ;;  %v329_v34 = vld [vmem:[#allocation6 + $0xd0] sm:$0xff]  ;;  %v405_v36 = vld [vmem:[#allocation6 + $0xe0] sm:$0xff] }
  0x51   :  { %1455 = vmatprep.subr.bf16.mxu1 %v1658_v0  ;;  %1444 = vmatpush1.bf16.msra.mxu0 %v1443_v19  ;;  %v1462_v35 = vpack.c.bf16 %v329_v34, %v328_v33  ;;  %v406_v37 = vld [vmem:[#allocation6 + $0xf0] sm:$0xff]  ;;  %v407_v40 = vld [vmem:[#allocation6 + $0x100] sm:$0xff] }
  0x52   :  { %1446 = vmatprep.subr.bf16.mxu0 %v1445_v20  ;;  %v1465_v39 = vpack.c.bf16 %v406_v37, %v405_v36  ;;  %v408_v41 = vld [vmem:[#allocation6 + $0x110] sm:$0xff]  ;;  %v251_v54 = vld [vmem:[#allocation7 + $0x2] ss:$0 sm:$0xff]  ;;  %v409_v8 = vld [vmem:[#allocation7 + $0x4] ss:$0 sm:$0xff] }
  0x53   :  { %v1468_v44 = vpack.c.bf16 %v408_v41, %v407_v40  ;;  %v589_v59 = vld [vmem:[#allocation6 + $0x160] sm:$0xff]  ;;  %v590_v60 = vld [vmem:[#allocation6 + $0x170] sm:$0xff] }
  0x54   :  { %1457 = vmatpush3.bf16.msra.mxu1 %v1456_v11  ;;  %v1477_v61 = vpack.c.bf16 %v590_v60, %v589_v59  ;;  %v591_v62 = vld [vmem:[#allocation6 + $0x180] sm:$0xff]  ;;  %v592_v63 = vld [vmem:[#allocation6 + $0x190] sm:$0xff] }
  0x55   :  { %1464 = vmatprep.subr.bf16.mxu1 %v1658_v0  ;;  %1448 = vmatpush1.bf16.msra.mxu0 %v1447_v23  ;;  %v1480_v2 = vpack.c.bf16 %v592_v63, %v591_v62  ;;  %v484_v3 = vld [vmem:[#allocation6 + $0x120] sm:$0xff]  ;;  %v485_v4 = vld [vmem:[#allocation6 + $0x130] sm:$0xff] }
  0x56   :  { %1458 = vmatprep.subr.bf16.mxu0 %v1658_v0  ;;  %v1471_v5 = vpack.c.bf16 %v485_v4, %v484_v3  ;;  %v486_v6 = vld [vmem:[#allocation6 + $0x140] sm:$0xff]  ;;  %v487_v7 = vld [vmem:[#allocation6 + $0x150] sm:$0xff] }
  0x57   :  { %v1474_v9 = vpack.c.bf16 %v487_v7, %v486_v6  ;;  %v668_v10 = vld [vmem:[#allocation6 + $0x1a0] sm:$0xff]  ;;  %v669_v11 = vld [vmem:[#allocation6 + $0x1b0] sm:$0xff] }
  0x58   :  { %1254 = vmatmul.mubr.msk.f32.vlgmr.msra.gmra.mrb[0].mxu0 %vm94_vm2, %v1752_v26  ;;  %v1483_v15 = vpack.c.bf16 %v669_v11, %v668_v10  ;;  %v330_v17 = vld [vmem:[#allocation7 + $0x3] ss:$0 sm:$0xff]  ;;  %v671_v25 = vld [vmem:[#allocation6 + $0x1d0] sm:$0xff]  ;;  %v593_v37 = vld [vmem:[#allocation7 + $0x6] ss:$0 sm:$0xff] }
  0x59   :  { %1460 = vmatpush3.bf16.msra.mxu0 %v1459_v27  ;;  %1347 = vmatprep.mubr.msk.f32.mxu0 %vm1659_vm0, %v1660_v1  ;;  %v670_v24 = vld [vmem:[#allocation6 + $0x1c0] sm:$0xff] }
  0x5a   :  { %1461 = vmatprep.subr.bf16.mxu0 %v1658_v0  ;;  %v1486_v27 = vpack.c.bf16 %v671_v25, %v670_v24  ;;  %v672_v42 = vld [vmem:[#allocation7 + $0x7] ss:$0 sm:$0xff]  ;;  %v73_v25 = vld [vmem:[%s1879_s2] sm:$0xff] }
  0x5b   :  { %v773_v60 = vld [vmem:[#allocation6 + $0x1e0] sm:$0xff] }
  0x5d   :  { %1463 = vmatpush3.bf16.msra.mxu0 %v1462_v35 }
  0x5e   :  { %1470 = vmatprep.subr.bf16.mxu0 %v1658_v0 }
 0x122   :  { %v242_v29 = vpop.f32.mrb[0].mxu1 }
 0x123   :  { %v243_v30 = vadd.f32 %v242_v29, %v171_v28  ;;  %v1327_v31 = vpop.f32.mrb[1].mxu1  ;;  %v488_v28 = vld [vmem:[#allocation7 + $0x5] ss:$0 sm:$0xff] }
 0x125   :  { %v246_v32 = vmax.f32 %v243_v30, 0.0 }
 0x127   :  { %1337 = vmatmul.mubr.msk.f32.vlgmr.msra.gmra.mrb[2].mxu1 %vm94_vm2, %v246_v32 }
 0x128   :  { %1358 = vmatprep.mubr.msk.f32.mxu1 %vm1659_vm0, %v1660_v1  ;;  %1466 = vmatpush3.bf16.msra.mxu1 %v1465_v39 }
 0x129   :  { %1467 = vmatprep.subr.bf16.mxu1 %v1658_v0 }
 0x12b   :  { %v164_v48 = vpop.f32.mrb[0].mxu0 }
 0x12c   :  { %1469 = vmatpush3.bf16.msra.mxu1 %v1468_v44  ;;  %v166_v50 = vpop.f32.mrb[1].mxu0  ;;  %v165_v51 = vadd.f32 %v164_v48, %v87_v47 }
 0x12d   :  { %v1765_v52 = vadd.f32 %v166_v50, %v91_v49  ;;  %1476 = vmatprep.subr.bf16.mxu1 %v1658_v0 }
 0x12e   :  { %v404_v53 = vmax.f32 %v165_v51, 0.0  ;;  %1004 = vrot.lane.b32.xlu1 %v165_v51, %s1661_s4  ;;  %584 = vrot.lane.b32.xlu0 %v165_v51, %s1662_s1 }
 0x130   :  { %1359 = vmatmul.mubr.msk.f32.vlgmr.msra.gmra.mrb[4].mxu1 %vm94_vm2, %v404_v53 }
 0x131   :  { %1380 = vmatprep.mubr.msk.f32.mxu1 %vm1659_vm0, %v1660_v1  ;;  %1478 = vmatpush3.bf16.msra.mxu1 %v1477_v61  ;;  %v774_v61 = vld [vmem:[#allocation6 + $0x1f0] sm:$0xff] }
 0x132   :  { %1479 = vmatprep.subr.bf16.mxu1 %v1658_v0  ;;  %v1489_v63 = vpack.c.bf16 %v774_v61, %v773_v60 }
 0x135   :  { %1481 = vmatpush3.bf16.msra.mxu1 %v1480_v2 }
 0x136   :  { %1488 = vmatprep.subr.bf16.mxu1 %v1658_v0 }
 0x1a0   :  { %v585_v19 = vpop.permute.xlu0 %584 }
 0x1fa   :  { %v321_v55 = vpop.f32.mrb[2].mxu1 }
 0x1fb   :  { %v322_v56 = vadd.f32 %v321_v55, %v251_v54  ;;  %v1338_v57 = vpop.f32.mrb[3].mxu1 }
 0x1fd   :  { %v325_v58 = vmax.f32 %v322_v56, 0.0 }
 0x1ff   :  { %1229 = vst [vmem:[%s1882_s5 + $0x8] sm:$0xff] %v325_v58  ;;  %1348 = vmatmul.mubr.msk.f32.vlgmr.msra.gmra.mrb[2].mxu0 %vm94_vm2, %v325_v58 }
 0x200   :  { %1369 = vmatprep.mubr.msk.f32.mxu0 %vm1659_vm0, %v1660_v1  ;;  %1472 = vmatpush3.bf16.msra.mxu0 %v1471_v5 }
 0x201   :  { %1473 = vmatprep.subr.bf16.mxu0 %v1658_v0 }
 0x203   :  { %v479_v12 = vpop.f32.mrb[4].mxu1 }
 0x204   :  { %v480_v13 = vadd.f32 %v479_v12, %v409_v8  ;;  %v1360_v14 = vpop.f32.mrb[5].mxu1  ;;  %1475 = vmatpush3.bf16.msra.mxu0 %v1474_v9 }
 0x205   :  { %1482 = vmatprep.subr.bf16.mxu0 %v1658_v0  ;;  %v850_v14 = vld [vmem:[#allocation6 + $0x200] sm:$0xff] }
 0x206   :  { %v483_v16 = vmax.f32 %v480_v13, 0.0 }
 0x208   :  { %1230 = vst [vmem:[%s1882_s5 + $0x10] sm:$0xff] %v483_v16  ;;  %1370 = vmatmul.mubr.msk.f32.vlgmr.msra.gmra.mrb[4].mxu0 %vm94_vm2, %v483_v16 }
 0x209   :  { %1484 = vmatpush3.bf16.msra.mxu0 %v1483_v15  ;;  %1391 = vmatprep.mubr.msk.f32.mxu0 %vm1659_vm0, %v1660_v1  ;;  %v851_v15 = vld [vmem:[#allocation6 + $0x210] sm:$0xff] }
 0x20a   :  { %1485 = vmatprep.subr.bf16.mxu0 %v1658_v0 }
 0x20d   :  { %1487 = vmatpush3.bf16.msra.mxu0 %v1486_v27 }
 0x20e   :  { %1491 = vmatprep.subr.bf16.mxu0 %v1658_v0 }
 0x2d2   :  { %v400_v18 = vpop.f32.mrb[2].mxu0 }
 0x2d3   :  { %v1790_v20 = vadd.f32 %v400_v18, %v330_v17  ;;  %v1349_v21 = vpop.f32.mrb[3].mxu0  ;;  %v1492_v18 = vpack.c.bf16 %v851_v15, %v850_v14 }
 0x2d5   :  { %v587_v22 = vadd.f32 %v585_v19, %v1790_v20 }
 0x2d7   :  { %v588_v23 = vmax.f32 %v587_v22, 0.0 }
 0x2d9   :  { %1381 = vmatmul.mubr.msk.f32.vlgmr.msra.gmra.mrb[6].mxu1 %vm94_vm2, %v588_v23 }
 0x2da   :  { %1398 = vmatprep.mubr.msk.f32.mxu1 %vm1659_vm0, %v1660_v1  ;;  %1490 = vmatpush3.bf16.msra.mxu1 %v1489_v63 }
 0x2db   :  { %v558_v29 = vpop.f32.mrb[4].mxu0  ;;  %1497 = vmatprep.subr.bf16.mxu1 %v1658_v0 }
 0x2dc   :  { %v1797_v30 = vadd.f32 %v558_v29, %v488_v28  ;;  %v1371_v31 = vpop.f32.mrb[5].mxu0 }
 0x2de   :  { %v562_v32 = vsub.f32 0.0, %v1797_v30  ;;  %v569_v43 = vand.u32 2147483647, %v1797_v30  ;;  %v568_v22 = vmax.f32 %v1797_v30, 0.0 }
 0x2e0   :  { %v563_v33 = vmul.f32 1.442695, %v562_v32  ;;  %v570_v47 = vsub.f32 0.0, %v569_v43  ;;  %v852_v32 = vld [vmem:[#allocation6 + $0x220] sm:$0xff]  ;;  %v854_v43 = vld [vmem:[#allocation7 + $0x11] ss:$0 sm:$0xff] }
 0x2e2   :  { %1524 = vpow2.f32 %v563_v33  ;;  %v571_v53 = vmul.f32 1.442695, %v570_v47  ;;  %v853_v33 = vld [vmem:[#allocation6 + $0x230] sm:$0xff] }
 0x2ec   :  { %v1525_v34 = vpop.eup %1524 }
 0x2ed   :  { %v565_v35 = vadd.f32 1.0, %v1525_v34  ;;  %v1495_v34 = vpack.c.bf16 %v853_v33, %v852_v32 }
 0x2ef   :  { %1526 = vrcp.f32 %v565_v35  ;;  %v775_v35 = vld [vmem:[#allocation7 + $0x10] ss:$0 sm:$0xff] }
 0x2f9   :  { %v1527_v36 = vpop.eup %1526 }
 0x2fa   :  { %1231 = vst.msk [vmem:[%s1882_s5 + $0x18] sm:$0xff] %vm172_vm1, %v1527_v36 }
 0x3ac   :  { %v663_v38 = vpop.f32.mrb[6].mxu1 }
 0x3ad   :  { %v664_v39 = vadd.f32 %v663_v38, %v593_v37  ;;  %v1382_v40 = vpop.f32.mrb[7].mxu1 }
 0x3ae   :  { %v929_v40 = vld [vmem:[#allocation6 + $0x240] sm:$0xff] }
 0x3af   :  { %v667_v41 = vmax.f32 %v664_v39, 0.0 }
 0x3b1   :  { %1237 = vst [vmem:[%s1882_s5 + $0x28] sm:$0xff] %v667_v41  ;;  %1392 = vmatmul.mubr.msk.f32.vlgmr.msra.gmra.mrb[6].mxu0 %vm94_vm2, %v667_v41  ;;  %v930_v41 = vld [vmem:[#allocation6 + $0x250] sm:$0xff] }
 0x3b2   :  { %1409 = vmatprep.mubr.msk.f32.mxu0 %vm1659_vm0, %v1660_v1  ;;  %1493 = vmatpush3.bf16.msra.mxu0 %v1492_v18 }
 0x3b3   :  { %1494 = vmatprep.subr.bf16.mxu0 %v1658_v0 }
 0x3b6   :  { %1496 = vmatpush3.bf16.msra.mxu0 %v1495_v34 }
 0x3b7   :  { %1506 = vmatprep.subr.bf16.mxu0 %v1658_v0 }
 0x484   :  { %v742_v44 = vpop.f32.mrb[6].mxu0 }
 0x485   :  { %v743_v45 = vadd.f32 %v742_v44, %v672_v42  ;;  %v1393_v46 = vpop.f32.mrb[7].mxu0  ;;  %v1498_v42 = vpack.c.bf16 %v930_v41, %v929_v40  ;;  %v1009_v44 = vld [vmem:[#allocation6 + $0x260] sm:$0xff] }
 0x487   :  { %v746_v48 = vsub.f32 0.0, %v743_v45  ;;  %v753_v49 = vand.u32 2147483647, %v743_v45  ;;  %v752_v10 = vmax.f32 %v743_v45, 0.0  ;;  %v1010_v45 = vld [vmem:[#allocation6 + $0x270] sm:$0xff] }
 0x489   :  { %v747_v50 = vmul.f32 1.442695, %v746_v48  ;;  %v754_v51 = vsub.f32 0.0, %v753_v49  ;;  %v1501_v49 = vpack.c.bf16 %v1010_v45, %v1009_v44 }
 0x48b   :  { %1528 = vpow2.f32 %v747_v50  ;;  %v755_v54 = vmul.f32 1.442695, %v754_v51  ;;  %v1011_v51 = vld [vmem:[#allocation6 + $0x280] sm:$0xff] }
 0x48d   :  { %1530 = vpow2.f32 %v755_v54 }
 0x48e   :  { %1532 = vpow2.f32 %v571_v53  ;;  %v1012_v53 = vld [vmem:[#allocation6 + $0x290] sm:$0xff] }
 0x48f   :  { %v1504_v54 = vpack.c.bf16 %v1012_v53, %v1011_v51 }
 0x495   :  { %v1529_v55 = vpop.eup %1528 }
 0x496   :  { %v749_v56 = vadd.f32 1.0, %v1529_v55  ;;  %v1005_v55 = vpop.permute.xlu1 %1004 }
 0x497   :  { %v1531_v57 = vpop.eup %1530 }
 0x498   :  { %1534 = vrcp.f32 %v749_v56  ;;  %v757_v58 = vadd.f32 1.0, %v1531_v57  ;;  %v1533_v59 = vpop.eup %1532  ;;  %v760_v2 = vmul.f32 -0.5, %v1531_v57  ;;  %v763_v5 = vand.u32 2147483647, %v1531_v57 }
 0x499   :  { %v573_v62 = vadd.f32 1.0, %v1533_v59  ;;  %v576_v9 = vmul.f32 -0.5, %v1533_v59  ;;  %v579_v17 = vand.u32 2147483647, %v1533_v59 }
 0x49a   :  { %1536 = vlog2.f32 %v757_v58  ;;  %v761_v3 = vadd.f32 1.0, %v760_v2  ;;  %vm764_vm3 = vcmp.lt.f32.partialorder %v763_v5, 0.0004427343  ;;  %v1088_v5 = vld [vmem:[#allocation6 + $0x2a0] sm:$0xff] }
 0x49b   :  { %1538 = vlog2.f32 %v573_v62  ;;  %v577_v13 = vadd.f32 1.0, %v576_v9  ;;  %vm580_vm4 = vcmp.lt.f32.partialorder %v579_v17, 0.0004427343 }
 0x49c   :  { %v762_v8 = vmul.f32 %v1531_v57, %v761_v3 }
 0x49d   :  { %v578_v21 = vmul.f32 %v1533_v59, %v577_v13  ;;  %v1013_v13 = vld [vmem:[#allocation7 + $0x12] ss:$0 sm:$0xff] }
 0x4a2   :  { %v1535_v4 = vpop.eup %1534 }
 0x4a3   :  { %1238 = vst.msk [vmem:[%s1882_s5 + $0x30] sm:$0xff] %vm172_vm1, %v1535_v4 }
 0x4a4   :  { %v1537_v6 = vpop.eup %1536 }
 0x4a5   :  { %v759_v7 = vmul.f32 0.6931472, %v1537_v6  ;;  %v1539_v16 = vpop.eup %1538  ;;  %v1089_v6 = vld [vmem:[#allocation6 + $0x2b0] sm:$0xff] }
 0x4a6   :  { %v575_v19 = vmul.f32 0.6931472, %v1539_v16 }
 0x4a7   :  { %v765_v11 = vsel %vm764_vm3, %v762_v8, %v759_v7  ;;  %v1507_v7 = vpack.c.bf16 %v1089_v6, %v1088_v5  ;;  %v1091_v8 = vld [vmem:[#allocation6 + $0x2d0] sm:$0xff] }
 0x4a8   :  { %v766_v12 = vadd.f32 %v765_v11, %v752_v10  ;;  %v581_v23 = vsel %vm580_vm4, %v578_v21, %v575_v19 }
 0x4a9   :  { %v582_v24 = vadd.f32 %v581_v23, %v568_v22 }
 0x4aa   :  { %768 = vrot.lane.b32.xlu0 %v766_v12, %s1663_s26 }
 0x4ae   :  { %1196 = vrot.lane.b32.xlu0 %v1765_v52, %s1661_s4 }
 0x4b2   :  { %1219 = vrot.lane.b32.xlu0 %v1752_v26, %s1661_s4 }
 0x4b6   :  { %1233 = vrot.lane.b32.xlu0 %v582_v24, %s1663_s26 }
 0x51c   :  { %v769_v27 = vpop.permute.xlu0 %768 }
 0x51d   :  { %v771_v28 = vmul.f32 %v769_v27, %v73_v25  ;;  %1239 = vst.msk [vmem:[%s1882_s5 + $0x38] sm:$0xff] %vm172_vm1, %v769_v27 }
 0x51f   :  { %v772_v29 = vadd.f32 %v1535_v4, %v771_v28 }
 0x520   :  { %v1831_v30 = vpop.permute.xlu0 %1196 }
 0x521   :  { %1399 = vmatmul.mubr.msk.f32.vlgmr.msra.gmra.mrb[8].mxu1 %vm172_vm1, %v772_v29 }
 0x522   :  { %1416 = vmatprep.mubr.msk.f32.mxu1 %vm1659_vm0, %v1660_v1  ;;  %1499 = vmatpush3.bf16.msra.mxu1 %v1498_v42 }
 0x523   :  { %1500 = vmatprep.subr.bf16.mxu1 %v1658_v0 }
 0x524   :  { %v1836_v26 = vpop.permute.xlu0 %1219 }
 0x528   :  { %v1234_v31 = vpop.permute.xlu0 %1233 }
 0x529   :  { %1236 = vst.msk [vmem:[%s1882_s5 + $0x20] sm:$0xff] %vm172_vm1, %v1234_v31 }
 0x5f4   :  { %v845_v36 = vpop.f32.mrb[8].mxu1 }
 0x5f5   :  { %v846_v37 = vadd.f32 %v845_v36, %v775_v35  ;;  %v1400_v38 = vpop.f32.mrb[9].mxu1 }
 0x5f7   :  { %v849_v39 = vmax.f32 %v846_v37, 0.0 }
 0x5f9   :  { %1410 = vmatmul.mubr.msk.f32.vlgmr.msra.gmra.mrb[8].mxu0 %vm94_vm2, %v849_v39 }
 0x5fa   :  { %1438 = vmatprep.mubr.msk.f32.mxu0 %vm1659_vm0, %v1660_v1  ;;  %1508 = vmatpush3.bf16.msra.mxu0 %v1507_v7 }
 0x5fb   :  { %1509 = vmatprep.subr.bf16.mxu0 %v1658_v0 }
 0x6cc   :  { %v924_v46 = vpop.f32.mrb[8].mxu0 }
 0x6cd   :  { %v925_v47 = vadd.f32 %v924_v46, %v854_v43  ;;  %v1411_v48 = vpop.f32.mrb[9].mxu0 }
 0x6cf   :  { %v928_v50 = vmax.f32 %v925_v47, 0.0 }
 0x6d1   :  { %1417 = vmatmul.mubr.msk.f32.vlgmr.msra.gmra.mrb[10].mxu1 %vm172_vm1, %v928_v50 }
 0x6d2   :  { %1502 = vmatpush3.bf16.msra.mxu1 %v1501_v49  ;;  %1427 = vmatprep.mubr.msk.f32.mxu1 %vm1659_vm0, %v1660_v1 }
 0x6d3   :  { %1503 = vmatprep.subr.bf16.mxu1 %v1658_v0 }
 0x6d6   :  { %1505 = vmatpush3.bf16.msra.mxu1 %v1504_v54 }
 0x7a4   :  { %v1000_v56 = vpop.f32.mrb[10].mxu1 }
 0x7a5   :  { %v1007_v57 = vadd.f32 %v1005_v55, %v1000_v56  ;;  %v1187_v58 = vadd.f32 %v1000_v56, %v1790_v20  ;;  %v1418_v59 = vpop.f32.mrb[11].mxu1  ;;  %v1090_v20 = vld [vmem:[#allocation6 + $0x2c0] sm:$0xff] }
 0x7a6   :  { %v1510_v9 = vpack.c.bf16 %v1091_v8, %v1090_v20 }
 0x7a7   :  { %v1008_v60 = vmax.f32 %v1007_v57, 0.0  ;;  %v1188_v61 = vadd.f32 %v1187_v58, %v1005_v55  ;;  %v1199_v0 = vadd.f32 %v1831_v30, %v1187_v58  ;;  %v1092_v30 = vld [vmem:[#allocation7 + $0x13] ss:$0 sm:$0xff] }
 0x7a8   :  { %1511 = vmatpush3.bf16.msra.mxu0 %v1510_v9 }
 0x7a9   :  { %v1189_v62 = vsub.f32 0.0, %v1188_v61  ;;  %1428 = vmatmul.mubr.msk.f32.vlgmr.msra.gmra.mrb[12].mxu1 %vm94_vm2, %v1008_v60  ;;  %v1200_v17 = vsub.f32 0.0, %v1199_v0 }
 0x7ab   :  { %v1190_v63 = vmul.f32 1.442695, %v1189_v62  ;;  %v1201_v18 = vmul.f32 1.442695, %v1200_v17 }
 0x7ad   :  { %1540 = vpow2.f32 %v1190_v63 }
 0x7b7   :  { %v1541_v1 = vpop.eup %1540 }
 0x7b8   :  { %v1192_v2 = vadd.f32 1.0, %v1541_v1 }
 0x7ba   :  { %1542 = vrcp.f32 %v1192_v2 }
 0x7c4   :  { %v1543_v3 = vpop.eup %1542 }
 0x7c5   :  { %v1206_v4 = vmul.f32 %v1543_v3, %v1765_v52 }
 0x7c7   :  { %1208 = vrot.lane.b32.xlu1 %v1206_v4, %s1661_s4 }
 0x839   :  { %v1209_v10 = vpop.permute.xlu1 %1208 }
 0x83a   :  { %v1211_v11 = vadd.f32 %v1209_v10, %v1187_v58 }
 0x83c   :  { %1544 = vtanh.f32 %v1211_v11 }
 0x83d   :  { %1546 = vpow2.f32 %v1201_v18 }
 0x846   :  { %v1545_v12 = vpop.eup %1544 }
 0x847   :  { %1215 = vrot.lane.b32.xlu1 %v1545_v12, %s1662_s1  ;;  %v1547_v19 = vpop.eup %1546 }
 0x848   :  { %v1203_v21 = vadd.f32 1.0, %v1547_v19 }
 0x84a   :  { %1548 = vrcp.f32 %v1203_v21 }
 0x854   :  { %v1549_v22 = vpop.eup %1548 }
 0x855   :  { %v1213_v23 = vsub.f32 1.0, %v1549_v22  ;;  %v1222_v25 = vmul.f32 %v1549_v22, %v1836_v26 }
 0x87c   :  { %v1083_v52 = vpop.f32.mrb[12].mxu1 }
 0x87d   :  { %v1084_v14 = vadd.f32 %v1083_v52, %v1013_v13  ;;  %v1429_v15 = vpop.f32.mrb[13].mxu1 }
 0x87f   :  { %v1087_v16 = vmax.f32 %v1084_v14, 0.0 }
 0x881   :  { %1240 = vst [vmem:[%s1882_s5 + $0x40] sm:$0xff] %v1087_v16  ;;  %1439 = vmatmul.mubr.msk.f32.vlgmr.msra.gmra.mrb[10].mxu0 %vm94_vm2, %v1087_v16 }
 0x8b9   :  { %v1216_v24 = vpop.permute.xlu1 %1215 }
 0x8ba   :  { %v1218_v27 = vmul.f32 %v1216_v24, %v1213_v23 }
 0x8bc   :  { %v1223_v28 = vadd.f32 %v1222_v25, %v1218_v27 }
 0x8be   :  { %1225 = vrot.lane.b32.xlu1 %v1223_v28, %s1661_s4 }
 0x930   :  { %v1226_v29 = vpop.permute.xlu1 %1225 }
 0x931   :  { %1228 = vst.msk [vmem:[%s1882_s5] sm:$0xff] %vm94_vm2, %v1226_v29 }
 0x954   :  { %v1162_v31 = vpop.f32.mrb[10].mxu0 }
 0x955   :  { %v1163_v32 = vadd.f32 %v1162_v31, %v1092_v30  ;;  %v1440_v33 = vpop.f32.mrb[11].mxu0 }
 0x957   :  { %v1166_v34 = vsub.f32 0.0, %v1163_v32  ;;  %v1173_v35 = vand.u32 2147483647, %v1163_v32  ;;  %v1172_v49 = vmax.f32 %v1163_v32, 0.0 }
 0x959   :  { %v1167_v36 = vmul.f32 1.442695, %v1166_v34  ;;  %v1174_v37 = vsub.f32 0.0, %v1173_v35 }
 0x95b   :  { %1550 = vpow2.f32 %v1167_v36  ;;  %v1175_v26 = vmul.f32 1.442695, %v1174_v37 }
 0x95d   :  { %1552 = vpow2.f32 %v1175_v26 }
 0x965   :  { %v1551_v38 = vpop.eup %1550 }
 0x966   :  { %v1169_v39 = vadd.f32 1.0, %v1551_v38 }
 0x967   :  { %v1553_v40 = vpop.eup %1552 }
 0x968   :  { %1554 = vrcp.f32 %v1169_v39  ;;  %v1177_v41 = vadd.f32 1.0, %v1553_v40  ;;  %v1180_v42 = vmul.f32 -0.5, %v1553_v40  ;;  %v1183_v45 = vand.u32 2147483647, %v1553_v40 }
 0x96a   :  { %1556 = vlog2.f32 %v1177_v41  ;;  %v1181_v43 = vadd.f32 1.0, %v1180_v42  ;;  %vm1184_vm5 = vcmp.lt.f32.partialorder %v1183_v45, 0.0004427343 }
 0x96c   :  { %v1182_v48 = vmul.f32 %v1553_v40, %v1181_v43 }
 0x972   :  { %v1555_v44 = vpop.eup %1554 }
 0x973   :  { %1241 = vst.msk [vmem:[%s1882_s5 + $0x48] sm:$0xff] %vm172_vm1, %v1555_v44 }
 0x974   :  { %v1557_v46 = vpop.eup %1556 }
 0x975   :  { %v1179_v47 = vmul.f32 0.6931472, %v1557_v46 }
 0x977   :  { %v1185_v50 = vsel %vm1184_vm5, %v1182_v48, %v1179_v47 }
 0x978   :  { %v1186_v51 = vadd.f32 %v1185_v50, %v1172_v49 }
 0x97a   :  { %1243 = vrot.lane.b32.xlu1 %v1186_v51, %s1663_s26 }
 0x9ec   :  { %v1244_v53 = vpop.permute.xlu1 %1243 }
 0x9ed   :  { %1246 = vst.msk [vmem:[%s1882_s5 + $0x50] sm:$0xff] %vm172_vm1, %v1244_v53 }
 0x9ee   :  { %1251 = vsyncpa [#allocation3], 1 }
 0x9ef   :  { %1252 = vsyncpa [#allocation5], 1 }
 0x9f0   :  { %1253 = vsyncpa [#allocation8], 1 }

</bundles_post_ra>
